<compile_context>
chip_gen: v6e
topology: v6e:2x2x1
jax: 0.10.0
libtpu: 0.0.40
codegen_flags: <defaults>
</compile_context>

<pallas_src>
import functools

import jax
import jax.numpy as jnp
from jax.experimental import pallas as pl
from jax.experimental.pallas import tpu as pltpu


def _round_up(n, m):
    return ((n + m - 1) // m) * m


def _policy_kernel(x_ref, w1_ref, b1_ref, w23_ref, b23_ref, out_ref, *,
                   action_dim):
    x = x_ref[...]

    # fc1 + relu (MXU, f32 accumulate)
    h = jnp.dot(x, w1_ref[...], preferred_element_type=jnp.float32) + b1_ref[...]
    h = jnp.maximum(h, 0.0)

    # Fused fc2 || fc3: lanes [0, A) are policy logits, lane A is the state
    # value, lanes > A are zero padding (weight columns are zero there).
    y = jnp.dot(h, w23_ref[...], preferred_element_type=jnp.float32) + b23_ref[...]

    lane = jax.lax.broadcasted_iota(jnp.int32, y.shape, dimension=1)
    is_logit = lane < action_dim
    is_value = lane == action_dim

    # Softmax over the true A logits only (padded lanes masked to -inf).
    logits = jnp.where(is_logit, y, -jnp.inf)
    m = jnp.max(logits, axis=-1, keepdims=True)
    e = jnp.where(is_logit, jnp.exp(logits - m), 0.0)
    denom = jnp.sum(e, axis=-1, keepdims=True)

    # EUP approx reciprocal + one Newton-Raphson step (keeps ~f32 accuracy,
    # so sum(probs) == 1 within 1e-5 still holds).
    r = pl.reciprocal(denom, approx=True)
    r = r * (2.0 - denom * r)
    probs = e * r

    # Single lane-dense, unmasked store of the combined slab.
    combined = jnp.where(is_logit, probs, jnp.where(is_value, y, 0.0))
    out_ref[...] = combined.astype(out_ref.dtype)


def policy_network_forward(x, params, *, tb=512):
    """x: (B, obs_dim) float32. params: dict of W1,b1,W2,b2,W3,b3.

    Returns (action_probs (B, A), state_values (B, 1)).
    """
    B, obs_dim = x.shape
    hidden = params["W1"].shape[1]
    action_dim = params["W2"].shape[1]

    # Lane-dense output width (>= action_dim + 1, multiple of 128).
    pad_n = max(128, _round_up(action_dim + 1, 128))

    # Fuse the two heads: W2 || W3 -> (hidden, pad_n), b2 || b3 -> (1, pad_n).
    w23 = jnp.zeros((hidden, pad_n), jnp.float32)
    w23 = w23.at[:, :action_dim].set(params["W2"])
    w23 = w23.at[:, action_dim:action_dim + 1].set(params["W3"])
    b23 = jnp.zeros((1, pad_n), jnp.float32)
    b23 = b23.at[:, :action_dim].set(params["b2"])
    b23 = b23.at[:, action_dim:action_dim + 1].set(params["b3"])

    # Batch tiling: TB rows per grid step (multiple of 8), pad B up to a
    # multiple of TB with zero rows (discarded on the way out).
    tb = min(tb, _round_up(B, 8))
    b_pad = _round_up(B, tb)
    if b_pad != B:
        x = jnp.pad(x, ((0, b_pad - B), (0, 0)))
    num_blocks = b_pad // tb

    cost = pl.CostEstimate(
        flops=2 * b_pad * (obs_dim * hidden + hidden * pad_n),
        transcendentals=b_pad * (pad_n + 1),
        bytes_accessed=4 * (b_pad * obs_dim + obs_dim * hidden + hidden
                            + hidden * pad_n + pad_n + b_pad * pad_n),
    )

    out = pl.pallas_call(
        functools.partial(_policy_kernel, action_dim=action_dim),
        out_shape=jax.ShapeDtypeStruct((b_pad, pad_n), jnp.float32),
        grid=(num_blocks,),
        in_specs=[
            pl.BlockSpec((tb, obs_dim), lambda i: (i, 0)),        # x (tiled)
            pl.BlockSpec((obs_dim, hidden), lambda i: (0, 0)),    # W1 (resident)
            pl.BlockSpec((1, hidden), lambda i: (0, 0)),          # b1
            pl.BlockSpec((hidden, pad_n), lambda i: (0, 0)),      # W2||W3
            pl.BlockSpec((1, pad_n), lambda i: (0, 0)),           # b2||b3
        ],
        out_specs=pl.BlockSpec((tb, pad_n), lambda i: (i, 0)),
        compiler_params=pltpu.CompilerParams(
            dimension_semantics=("parallel",)),
        cost_estimate=cost,
    )(x, params["W1"], params["b1"], w23, b23)

    probs = out[:B, :action_dim]
    vals = out[:B, action_dim:action_dim + 1]
    return probs, vals


def init_params(key, obs_dim, action_dim, hidden=64):
    """Deterministic init mimicking nn.Linear's U(-1/sqrt(in), 1/sqrt(in))."""
    ks = jax.random.split(key, 6)

    def lin(kw, kb, fan_in, fan_out):
        bound = 1.0 / jnp.sqrt(fan_in)
        W = jax.random.uniform(kw, (fan_in, fan_out), jnp.float32, -bound, bound)
        b = jax.random.uniform(kb, (1, fan_out), jnp.float32, -bound, bound)
        return W, b

    W1, b1 = lin(ks[0], ks[1], obs_dim, hidden)
    W2, b2 = lin(ks[2], ks[3], hidden, action_dim)
    W3, b3 = lin(ks[4], ks[5], hidden, 1)
    return {"W1": W1, "b1": b1, "W2": W2, "b2": b2, "W3": W3, "b3": b3}


if __name__ == "__main__":
    key = jax.random.PRNGKey(0)
    k_x, k_p = jax.random.split(key)

    B, obs_dim, action_dim = 8, 32, 8
    x = jax.random.normal(k_x, (B, obs_dim), dtype=jnp.float32)
    params = init_params(k_p, obs_dim, action_dim)

    probs, vals = jax.jit(policy_network_forward)(x, params)
    jax.block_until_ready((probs, vals))

    # Reference check against plain JAX.
    h_ref = jnp.maximum(x @ params["W1"] + params["b1"], 0.0)
    probs_ref = jax.nn.softmax(h_ref @ params["W2"] + params["b2"], axis=-1)
    vals_ref = h_ref @ params["W3"] + params["b3"]
    assert probs.shape == (B, action_dim) and vals.shape == (B, 1)
    assert jnp.allclose(probs, probs_ref, atol=1e-5)
    assert jnp.allclose(vals, vals_ref, atol=1e-5)
    assert jnp.allclose(jnp.sum(probs, axis=-1), 1.0, atol=1e-5)

    print("KERNEL_OK")
</pallas_src>

<mosaic_0001>
module attributes {stable_mosaic.version = 11 : i64} {
  func.func @_policy_kernel(%arg0: i32, %arg1: memref<8x32xf32, #tpu.memory_space<vmem>>, %arg2: memref<32x64xf32, #tpu.memory_space<vmem>>, %arg3: memref<1x64xf32, #tpu.memory_space<vmem>>, %arg4: memref<64x128xf32, #tpu.memory_space<vmem>>, %arg5: memref<1x128xf32, #tpu.memory_space<vmem>>, %arg6: memref<8x128xf32, #tpu.memory_space<vmem>>) attributes {dimension_semantics = [#tpu.dimension_semantics<parallel>], iteration_bounds = array<i64: 1>, scalar_prefetch = 0 : i64, scratch_operands = 0 : i64, tpu.core_type = #tpu.core_type<tc>, window_params = [{transform_indices = @transform_0, window_bounds = array<i64: 8, 32>}, {pipeline_mode = #tpu.pipeline_mode<synchronous>, transform_indices = @transform_1, window_bounds = array<i64: 32, 64>}, {pipeline_mode = #tpu.pipeline_mode<synchronous>, transform_indices = @transform_2, window_bounds = array<i64: 1, 64>}, {pipeline_mode = #tpu.pipeline_mode<synchronous>, transform_indices = @transform_3, window_bounds = array<i64: 64, 128>}, {pipeline_mode = #tpu.pipeline_mode<synchronous>, transform_indices = @transform_4, window_bounds = array<i64: 1, 128>}, {transform_indices = @transform_5, window_bounds = array<i64: 8, 128>}]} {
    %c0 = arith.constant 0 : index
    %c0_0 = arith.constant 0 : index
    %0 = vector.load %arg1[%c0, %c0_0] : memref<8x32xf32, #tpu.memory_space<vmem>>, vector<8x32xf32>
    %c0_1 = arith.constant 0 : index
    %c0_2 = arith.constant 0 : index
    %1 = vector.load %arg2[%c0_1, %c0_2] : memref<32x64xf32, #tpu.memory_space<vmem>>, vector<32x64xf32>
    %cst = arith.constant dense<0.000000e+00> : vector<8x64xf32>
    %2 = tpu.matmul %0, %1, %cst {dimension_numbers = #tpu.dot_dimension_numbers<[1], [0], [0], [1], [0, 0, 1, 1], [], []>} : vector<8x32xf32>, vector<32x64xf32>, vector<8x64xf32> -> vector<8x64xf32>
    %c0_3 = arith.constant 0 : index
    %c0_4 = arith.constant 0 : index
    %3 = vector.load %arg3[%c0_3, %c0_4] : memref<1x64xf32, #tpu.memory_space<vmem>>, vector<1x64xf32>
    %4 = vector.broadcast %3 : vector<1x64xf32> to vector<8x64xf32>
    %5 = arith.addf %2, %4 : vector<8x64xf32>
    %cst_5 = arith.constant 0.000000e+00 : f32
    %6 = vector.broadcast %cst_5 : f32 to vector<8x64xf32>
    %7 = arith.maximumf %5, %6 : vector<8x64xf32>
    %c0_6 = arith.constant 0 : index
    %c0_7 = arith.constant 0 : index
    %8 = vector.load %arg4[%c0_6, %c0_7] : memref<64x128xf32, #tpu.memory_space<vmem>>, vector<64x128xf32>
    %cst_8 = arith.constant dense<0.000000e+00> : vector<8x128xf32>
    %9 = tpu.matmul %7, %8, %cst_8 {dimension_numbers = #tpu.dot_dimension_numbers<[1], [0], [0], [1], [0, 0, 1, 1], [], []>} : vector<8x64xf32>, vector<64x128xf32>, vector<8x128xf32> -> vector<8x128xf32>
    %c0_9 = arith.constant 0 : index
    %c0_10 = arith.constant 0 : index
    %10 = vector.load %arg5[%c0_9, %c0_10] : memref<1x128xf32, #tpu.memory_space<vmem>>, vector<1x128xf32>
    %11 = vector.broadcast %10 : vector<1x128xf32> to vector<8x128xf32>
    %12 = arith.addf %9, %11 : vector<8x128xf32>
    %13 = tpu.iota {dimensions = array<i32: 1>} : vector<8x128xi32>
    %c8_i32 = arith.constant 8 : i32
    %14 = vector.broadcast %c8_i32 : i32 to vector<8x128xi32>
    %15 = arith.cmpi slt, %13, %14 : vector<8x128xi32>
    %c8_i32_11 = arith.constant 8 : i32
    %16 = vector.broadcast %c8_i32_11 : i32 to vector<8x128xi32>
    %17 = arith.cmpi eq, %13, %16 : vector<8x128xi32>
    %cst_12 = arith.constant 0xFF800000 : f32
    %18 = vector.broadcast %cst_12 : f32 to vector<8x128xf32>
    %19 = arith.select %15, %12, %18 : vector<8x128xi1>, vector<8x128xf32>
    %cst_13 = arith.constant dense<0xFF800000> : vector<8xf32>
    %20 = vector.multi_reduction <maximumf>, %19, %cst_13 [1] : vector<8x128xf32> to vector<8xf32>
    %21 = vector.shape_cast %20 : vector<8xf32> to vector<8x1xf32>
    %22 = vector.broadcast %21 : vector<8x1xf32> to vector<8x128xf32>
    %23 = arith.subf %19, %22 : vector<8x128xf32>
    %24 = math.exp %23 : vector<8x128xf32>
    %cst_14 = arith.constant 0.000000e+00 : f32
    %25 = vector.broadcast %cst_14 : f32 to vector<8x128xf32>
    %26 = arith.select %15, %24, %25 : vector<8x128xi1>, vector<8x128xf32>
    %cst_15 = arith.constant dense<0.000000e+00> : vector<8xf32>
    %27 = vector.multi_reduction <add>, %26, %cst_15 [1] : vector<8x128xf32> to vector<8xf32>
    %28 = vector.shape_cast %27 : vector<8xf32> to vector<8x1xf32>
    %29 = tpu.reciprocal %28 {approx = true} : vector<8x1xf32> -> vector<8x1xf32>
    %30 = arith.mulf %28, %29 : vector<8x1xf32>
    %cst_16 = arith.constant 2.000000e+00 : f32
    %31 = vector.broadcast %cst_16 : f32 to vector<8x1xf32>
    %32 = arith.subf %31, %30 : vector<8x1xf32>
    %33 = arith.mulf %29, %32 : vector<8x1xf32>
    %34 = vector.broadcast %33 : vector<8x1xf32> to vector<8x128xf32>
    %35 = arith.mulf %26, %34 : vector<8x128xf32>
    %cst_17 = arith.constant 0.000000e+00 : f32
    %36 = vector.broadcast %cst_17 : f32 to vector<8x128xf32>
    %37 = arith.select %17, %12, %36 : vector<8x128xi1>, vector<8x128xf32>
    %38 = arith.select %15, %35, %37 : vector<8x128xi1>, vector<8x128xf32>
    %c0_18 = arith.constant 0 : index
    %c0_19 = arith.constant 0 : index
    %39 = vector.load %arg6[%c0_18, %c0_19] : memref<8x128xf32, #tpu.memory_space<vmem>>, vector<8x128xf32>
    tpu.vector_store %arg6[%c0_18, %c0_19], %38 {strides = array<i32>} : memref<8x128xf32, #tpu.memory_space<vmem>>, vector<8x128xf32>,
    return
  }
  func.func @transform_0(%arg0: i32) -> (i32, i32) {
    %c0_i32 = arith.constant 0 : i32
    %c0_i32_0 = arith.constant 0 : i32
    return %arg0, %c0_i32 : i32, i32
  }
  func.func @transform_1(%arg0: i32) -> (i32, i32) {
    %c0_i32 = arith.constant 0 : i32
    %c0_i32_0 = arith.constant 0 : i32
    %c0_i32_1 = arith.constant 0 : i32
    return %c0_i32, %c0_i32_0 : i32, i32
  }
  func.func @transform_2(%arg0: i32) -> (i32, i32) {
    %c0_i32 = arith.constant 0 : i32
    %c0_i32_0 = arith.constant 0 : i32
    %c0_i32_1 = arith.constant 0 : i32
    return %c0_i32, %c0_i32_0 : i32, i32
  }
  func.func @transform_3(%arg0: i32) -> (i32, i32) {
    %c0_i32 = arith.constant 0 : i32
    %c0_i32_0 = arith.constant 0 : i32
    %c0_i32_1 = arith.constant 0 : i32
    return %c0_i32, %c0_i32_0 : i32, i32
  }
  func.func @transform_4(%arg0: i32) -> (i32, i32) {
    %c0_i32 = arith.constant 0 : i32
    %c0_i32_0 = arith.constant 0 : i32
    %c0_i32_1 = arith.constant 0 : i32
    return %c0_i32, %c0_i32_0 : i32, i32
  }
  func.func @transform_5(%arg0: i32) -> (i32, i32) {
    %c0_i32 = arith.constant 0 : i32
    %c0_i32_0 = arith.constant 0 : i32
    return %arg0, %c0_i32 : i32, i32
  }
}

</mosaic_0001>

<bundles_post_ra>
// kernel: policy_network_forward.1
= control target key start
LH: loop header
LB: loop body
LE: loop exit
PB: predicated region body
PF: predicated region fallthrough
CT: control target
= control target key end

     0   :  { %v275_v0 = vmov 0.0   ;;  %vm276_vm0 = vmmov 0   ;;  %vm32_vm1 = vcmask 261120   ;;  %vm122_vm2 = vcmask 523264   ;;  %s360_s1 = inlined_call_operand.vmem [shape: f32[32,64], index: 1, kind: input, shape index: {}]   ;;  %s361_s3 = inlined_call_operand.vmem [shape: f32[64,128], index: 3, kind: input, shape index: {}]   ;;  %s362_s0 = inlined_call_operand.vmem [shape: f32[8,32], index: 0, kind: input, shape index: {}]   ;;  %s363_s2 = inlined_call_operand.vmem [shape: f32[1,64], index: 2, kind: input, shape index: {}]   ;;  %s364_s4 = inlined_call_operand.vmem [shape: f32[1,128], index: 4, kind: input, shape index: {}]   ;;  %s365_s5 = inlined_call_operand.vmem [shape: f32[8,128], index: 5, kind: output, shape index: {}]  }
   0x1   :  { %239 = vmatprep.subr.mxu0 %v275_v0  ;;  %v24_v1 = vld [vmem:[%s360_s1 + $0x18] sm:$0xff]  ;;  %v23_v2 = vld [vmem:[%s360_s1 + $0x10] sm:$0xff]  ;;  %247 = vmatprep.mubr.msk.f32.mxu0 %vm276_vm0, %v275_v0  ;;  %v22_v4 = vld [vmem:[%s360_s1 + $0x8] sm:$0xff]  ;;  %v196_v19 = vlaneseq }
   0x2   :  { %240 = vmatpush3.msra.mxu0 %v24_v1  ;;  %250 = vmatprep.subr.mxu1 %v275_v0  ;;  %v114_v3 = vld [vmem:[%s361_s3 + $0x38] sm:$0xff]  ;;  %v113_v5 = vld [vmem:[%s361_s3 + $0x30] sm:$0xff]  ;;  %v112_v6 = vld [vmem:[%s361_s3 + $0x28] sm:$0xff] }
   0x3   :  { %241 = vmatprep.subr.mxu0 %v275_v0  ;;  %251 = vmatpush3.msra.mxu1 %v114_v3  ;;  %v21_v7 = vld [vmem:[%s360_s1] sm:$0xff]  ;;  %v110_v10 = vld [vmem:[%s361_s3 + $0x18] sm:$0xff]  ;;  %v109_v11 = vld [vmem:[%s361_s3 + $0x10] sm:$0xff]  ;;  %v197_v20 = vand.u32 127, %v196_v19 }
   0x4   :  { %242 = vmatpush3.msra.mxu0 %v23_v2  ;;  %252 = vmatprep.subr.mxu1 %v275_v0  ;;  %v20_v8 = vld [vmem:[%s362_s0] sm:$0xff]  ;;  %v108_v12 = vld [vmem:[%s361_s3 + $0x8] sm:$0xff] }
   0x5   :  { %243 = vmatprep.subr.mxu0 %v275_v0  ;;  %253 = vmatpush3.msra.mxu1 %v113_v5  ;;  %v111_v9 = vld [vmem:[%s361_s3 + $0x20] sm:$0xff]  ;;  %vm199_vm3 = vcmp.eq.s32.totalorder %v197_v20, 8  ;;  %vm198_vm4 = vcmp.lt.s32.totalorder %v197_v20, 8 }
   0x6   :  { %244 = vmatpush3.msra.mxu0 %v22_v4  ;;  %254 = vmatprep.subr.mxu1 %v275_v0  ;;  %v107_v13 = vld [vmem:[%s361_s3] sm:$0xff] }
   0x7   :  { %245 = vmatprep.subr.mxu0 %v275_v0  ;;  %255 = vmatpush3.msra.mxu1 %v112_v6  ;;  %v221_v14 = vld [vmem:[%s363_s2] ss:$0 sm:$0xff] }
   0x8   :  { %246 = vmatpush3.msra.mxu0 %v21_v7  ;;  %256 = vmatprep.subr.mxu1 %v275_v0  ;;  %v223_v21 = vld [vmem:[%s364_s4] ss:$0 sm:$0xff] }
   0x9   :  { %248 = vmatmul.mubr.msk.f32.vlgmr.msra.gmra.mxu0 %vm32_vm1, %v20_v8  ;;  %257 = vmatpush3.msra.mxu1 %v111_v9 }
   0xa   :  { %258 = vmatprep.subr.mxu1 %v275_v0  ;;  %266 = vmatprep.mubr.msk.f32.mxu1 %vm276_vm0, %v275_v0 }
   0xb   :  { %259 = vmatpush3.msra.mxu1 %v110_v10 }
   0xc   :  { %260 = vmatprep.subr.mxu1 %v275_v0 }
   0xd   :  { %261 = vmatpush3.msra.mxu1 %v109_v11 }
   0xe   :  { %262 = vmatprep.subr.mxu1 %v275_v0 }
   0xf   :  { %263 = vmatpush3.msra.mxu1 %v108_v12 }
  0x10   :  { %264 = vmatprep.subr.mxu1 %v275_v0 }
  0x11   :  { %265 = vmatpush3.msra.mxu1 %v107_v13 }
  0xc9   :  { %v102_v15 = vpop.f32.mrf.mxu0 }
  0xca   :  { %v103_v16 = vadd.f32 %v221_v14, %v102_v15 }
  0xcb   :  { %v249_v17 = vpop.f32.mrf.mxu0 }
  0xcc   :  { %v106_v18 = vmax.f32 %v103_v16, 0.0 }
  0xce   :  { %267 = vmatmul.mubr.msk.f32.vlgmr.msra.gmra.mxu1 %vm122_vm2, %v106_v18 }
 0x18e   :  { %v192_v22 = vpop.f32.mrf.mxu1 }
 0x18f   :  { %v193_v23 = vadd.f32 %v223_v21, %v192_v22 }
 0x190   :  { %v268_v24 = vpop.f32.mrf.mxu1 }
 0x191   :  { %v214_v25 = vsel %vm199_vm3, %v193_v23, 0.0  ;;  %v200_v26 = vsel %vm198_vm4, %v193_v23, -inf }
 0x192   :  { %201 = vmax.xlane.f32.xlu0 %v200_v26 }
 0x21b   :  { %v202_v27 = vpop.xlane.xlu0 %201 }
 0x21c   :  { %v203_v28 = vsub.f32 %v200_v26, %v202_v27 }
 0x21e   :  { %v204_v29 = vmul.f32 1.442695, %v203_v28 }
 0x220   :  { %271 = vpow2.f32 %v204_v29 }
 0x22d   :  { %v272_v30 = vpop.eup %271 }
 0x22e   :  { %v206_v31 = vsel %vm198_vm4, %v272_v30, 0.0 }
 0x22f   :  { %207 = vadd.xlane.f32.xlu0 %v206_v31 }
 0x2b8   :  { %v208_v32 = vpop.xlane.xlu0 %207 }
 0x2b9   :  { %273 = vrcp.f32 %v208_v32 }
 0x2c6   :  { %v274_v33 = vpop.eup %273 }
 0x2c7   :  { %v210_v34 = vmul.f32 %v274_v33, %v208_v32 }
 0x2c9   :  { %v211_v35 = vsub.f32 2.0, %v210_v34 }
 0x2cb   :  { %v212_v36 = vmul.f32 %v274_v33, %v211_v35 }
 0x2cd   :  { %v213_v37 = vmul.f32 %v212_v36, %v206_v31 }
 0x2cf   :  { %v215_v38 = vsel %vm198_vm4, %v213_v37, %v214_v25 }
 0x2d0   :  { %216 = vst [vmem:[%s365_s5] sm:$0xff] %v215_v38 }

</bundles_post_ra>
